<compile_context>
chip_gen: v7x
topology: tpu7x:2x2x1
jax: 0.10.0
libtpu: 0.0.40
codegen_flags: <defaults>
</compile_context>

<pallas_src>
import jax
import jax.numpy as jnp
from jax.experimental import pallas as pl
from jax.experimental.pallas import tpu as pltpu

_INV_SQRT2 = 0.7071067811865476


def _gelu_exact(x):
    # PyTorch F.gelu default = exact erf-based GELU.
    return 0.5 * x * (1.0 + jax.lax.erf(x * _INV_SQRT2))


def _ffn_kernel(x_ref, w1g_ref, w1v_ref, b1_ref, w2_ref, b2_ref, o_ref, acc_ref):
    n = pl.program_id(1)

    @pl.when(n == 0)
    def _():
        acc_ref[...] = jnp.zeros_like(acc_ref)

    x = x_ref[...]
    # Gate half first: gelu(gate) is computed before the value half is
    # materialized, keeping only two (tm, tn) f32 intermediates live at once.
    hg = jnp.dot(x, w1g_ref[...], preferred_element_type=jnp.float32) + b1_ref[1:2, :]
    g = _gelu_exact(hg)
    hv = jnp.dot(x, w1v_ref[...], preferred_element_type=jnp.float32) + b1_ref[0:1, :]
    g = g * hv

    # Down-projection of this d_inner slab, accumulated in f32.
    # (astype is a no-op for f32 weights; deliberate downcast for bf16 weights.)
    acc_ref[...] += jnp.dot(g.astype(w2_ref.dtype), w2_ref[...],
                            preferred_element_type=jnp.float32)

    @pl.when(n == pl.num_programs(1) - 1)
    def _():
        o_ref[...] = (acc_ref[...] + b2_ref[...]).astype(o_ref.dtype)


def _vmem_cap_bytes():
    """Generation-aware per-TensorCore VMEM budget (~7/8 of physical)."""
    try:
        phys = int(pltpu.get_tpu_info().vmem_capacity_bytes)
    except Exception:
        phys = 64 << 20  # conservative fallback == v7x per-TC VMEM
    return (phys * 7) // 8


def _pick_tn(d_in, d_inner, w_bytes, cap):
    """d_inner slab width: largest 128-multiple whose double-buffered weight
    slabs (w1 gate + w1 value + w2) fit the generation-aware slab budget."""
    if d_inner % 128 != 0:
        return d_inner  # small / odd sizes: single full-width slab
    slab_budget = cap // 4
    for cand in (d_inner, 4096, 2048, 1024, 512, 256, 128):
        if d_inner % cand == 0 and 2 * 3 * d_in * cand * w_bytes <= slab_budget:
            return cand
    return 128


def _vmem_estimate(tm, tn, d_in, cd_bytes, out_bytes):
    x_tile = 2 * tm * d_in * cd_bytes            # input rows, double buffered
    out_tile = 2 * tm * d_in * out_bytes         # output rows, double buffered
    w_slabs = 2 * 3 * d_in * tn * cd_bytes       # weight slabs, double buffered
    biases = 2 * (2 * tn + d_in) * 4             # f32 bias tiles
    acc = tm * d_in * 4                          # f32 accumulator scratch
    interm = 3 * tm * tn * 4                     # hg / g / hv live f32 tiles
    return x_tile + out_tile + w_slabs + biases + acc + interm


def _pick_tm(tn, d_in, cd_bytes, out_bytes, cap):
    """Largest row tile whose VMEM estimate leaves headroom under the cap.
    Bigger tm directly cuts weight HBM re-streaming (once per row tile)."""
    budget = (cap * 7) // 10  # headroom for Mosaic internal scratch / spills
    for cand in (1024, 768, 512, 384, 256, 192, 128, 64, 32, 16, 8):
        if _vmem_estimate(cand, tn, d_in, cd_bytes, out_bytes) <= budget:
            return cand
    return 8


def gated_feed_forward(x, w1, b1, w2, b2, *, tm=None, tn=None,
                       compute_dtype=jnp.bfloat16):
    """x: (M, d_in); w1: (d_in, 2*d_inner); b1: (2*d_inner,);
       w2: (d_inner, d_in); b2: (d_in,). Returns (M, d_in) in x.dtype.

    compute_dtype: dtype of the matmul operands (bf16 recommended on v6e/v7x;
    accumulation is always f32; biases stay f32). Use jnp.float32 for bit-close
    parity with a pure-f32 reference.
    """
    M, d_in = x.shape
    two_d_inner = w1.shape[1]
    d_inner = two_d_inner // 2
    assert w1.shape == (d_in, two_d_inner)
    assert b1.shape == (two_d_inner,)
    assert w2.shape == (d_inner, d_in)
    assert b2.shape == (d_in,)

    out_dtype = x.dtype
    cd = jnp.dtype(compute_dtype) if compute_dtype is not None else jnp.dtype(x.dtype)
    cd_bytes = cd.itemsize
    out_bytes = jnp.dtype(out_dtype).itemsize

    # Split the fused projection (so the kernel never slices the lane axis) and
    # cast matmul operands to the compute dtype. Biases stay f32.
    w1v = w1[:, :d_inner].astype(cd)
    w1g = w1[:, d_inner:].astype(cd)
    w2c = w2.astype(cd)
    xc = x.astype(cd)
    b1_vg = jnp.stack([b1[:d_inner], b1[d_inner:]], axis=0).astype(jnp.float32)  # (2, d_inner)
    b2_2d = b2.reshape(1, d_in).astype(jnp.float32)

    cap = _vmem_cap_bytes()

    if tn is None:
        tn = _pick_tn(d_in, d_inner, cd_bytes, cap)
    assert d_inner % tn == 0, "tn must divide d_inner"
    assert tn % 128 == 0 or tn == d_inner, "tn must be lane-aligned or full-width"

    if tm is None:
        tm = _pick_tm(tn, d_in, cd_bytes, out_bytes, cap)

    # Row tiling: no full-array padding copy. For M > tm the last (ragged) row
    # tile is handled by Pallas with masked output writes.
    if M <= tm:
        tm_eff = M            # single full-extent row block (any M allowed)
        grid_m = 1
    else:
        assert tm % 8 == 0, "tm must be a multiple of 8 when tiling rows"
        tm_eff = tm
        grid_m = pl.cdiv(M, tm_eff)

    grid = (grid_m, d_inner // tn)

    # Advisory cost estimate: 2 matmuls of M x d_in x d_inner (and back), one
    # erf per hidden element, weights re-streamed once per row tile.
    flops = 6 * M * d_in * d_inner
    transcendentals = M * d_inner
    bytes_accessed = (M * d_in * (cd_bytes + out_bytes)
                      + grid_m * (3 * d_in * d_inner * cd_bytes)
                      + (2 * d_inner + d_in) * 4)

    out = pl.pallas_call(
        _ffn_kernel,
        out_shape=jax.ShapeDtypeStruct((M, d_in), out_dtype),
        grid_spec=pltpu.PrefetchScalarGridSpec(
            num_scalar_prefetch=0,
            grid=grid,
            in_specs=[
                pl.BlockSpec((tm_eff, d_in), lambda i, n: (i, 0)),   # x rows
                pl.BlockSpec((d_in, tn), lambda i, n: (0, n)),       # w1 gate slab
                pl.BlockSpec((d_in, tn), lambda i, n: (0, n)),       # w1 value slab
                pl.BlockSpec((2, tn), lambda i, n: (0, n)),          # b1 [value; gate]
                pl.BlockSpec((tn, d_in), lambda i, n: (n, 0)),       # w2 slab
                pl.BlockSpec((1, d_in), lambda i, n: (0, 0)),        # b2 (resident)
            ],
            out_specs=pl.BlockSpec((tm_eff, d_in), lambda i, n: (i, 0)),
            scratch_shapes=[pltpu.VMEM((tm_eff, d_in), jnp.float32)],
        ),
        compiler_params=pltpu.CompilerParams(
            # TODO(synk): on v7x with grid_m == 1 (decode-style M), add a
            # parallel split over d_in output columns so both TensorCores work.
            dimension_semantics=("parallel", "arbitrary"),
            vmem_limit_bytes=int(cap),
        ),
        cost_estimate=pl.CostEstimate(
            flops=flops,
            transcendentals=transcendentals,
            bytes_accessed=bytes_accessed,
        ),
    )(xc, w1g, w1v, b1_vg, w2c, b2_2d)

    return out


def _reference(x, w1, b1, w2, b2):
    h = x @ w1 + b1
    d_inner = w1.shape[1] // 2
    val, gate = h[:, :d_inner], h[:, d_inner:]
    g = _gelu_exact(gate) * val
    return g @ w2 + b2


if __name__ == "__main__":
    # Small, lane-aligned demo shapes; M=26 exercises the ragged row-tile path.
    batch, seq, d_in, d_inner = 2, 13, 128, 256
    key = jax.random.PRNGKey(0)
    kx, k1, k2, k3, k4 = jax.random.split(key, 5)

    x = jax.random.normal(kx, (batch, seq, d_in), dtype=jnp.float32)
    w1 = jax.random.normal(k1, (d_in, 2 * d_inner), dtype=jnp.float32) * (1.0 / jnp.sqrt(d_in))
    b1 = jax.random.normal(k2, (2 * d_inner,), dtype=jnp.float32) * 0.01
    w2 = jax.random.normal(k3, (d_inner, d_in), dtype=jnp.float32) * (1.0 / jnp.sqrt(d_inner))
    b2 = jax.random.normal(k4, (d_in,), dtype=jnp.float32) * 0.01

    x_flat = x.reshape(batch * seq, d_in)
    ref = _reference(x_flat, w1, b1, w2, b2)

    # f32 compute path: tight parity with the f32 reference.
    out_f32 = gated_feed_forward(x_flat, w1, b1, w2, b2, compute_dtype=jnp.float32)
    jax.block_until_ready(out_f32)
    assert jnp.allclose(out_f32, ref, atol=1e-3, rtol=1e-3), "f32-path mismatch"

    # Default path: bf16 operands, f32 accumulation (loose tolerance vs f32 ref).
    out_bf16 = gated_feed_forward(x_flat, w1, b1, w2, b2)
    jax.block_until_ready(out_bf16)
    assert jnp.allclose(out_bf16, ref, atol=1e-1, rtol=1e-1), "bf16-path mismatch"

    # Tiled path: multiple row tiles (ragged last tile: M=26, tm=16) and
    # multiple d_inner slabs exercising the f32 accumulator.
    out_tiled = gated_feed_forward(x_flat, w1, b1, w2, b2, tm=16, tn=128,
                                   compute_dtype=jnp.float32)
    jax.block_until_ready(out_tiled)
    assert jnp.allclose(out_tiled, ref, atol=1e-3, rtol=1e-3), "tiled-path mismatch"

    print("KERNEL_OK")
</pallas_src>

<mosaic_0001>
module attributes {stable_mosaic.version = 11 : i64} {
  func.func @_ffn_kernel(%arg0: i32, %arg1: i32, %arg2: memref<26x128xf32, #tpu.memory_space<vmem>>, %arg3: memref<128x256xf32, #tpu.memory_space<vmem>>, %arg4: memref<128x256xf32, #tpu.memory_space<vmem>>, %arg5: memref<2x256xf32, #tpu.memory_space<vmem>>, %arg6: memref<256x128xf32, #tpu.memory_space<vmem>>, %arg7: memref<1x128xf32, #tpu.memory_space<vmem>>, %arg8: memref<26x128xf32, #tpu.memory_space<vmem>>, %arg9: memref<26x128xf32, #tpu.memory_space<vmem>>) attributes {dimension_semantics = [#tpu.dimension_semantics<parallel>, #tpu.dimension_semantics<arbitrary>], iteration_bounds = array<i64: 1, 1>, scalar_prefetch = 0 : i64, scratch_operands = 1 : i64, tpu.core_type = #tpu.core_type<tc>, window_params = [{transform_indices = @transform_0, window_bounds = array<i64: 26, 128>}, {transform_indices = @transform_1, window_bounds = array<i64: 128, 256>}, {transform_indices = @transform_2, window_bounds = array<i64: 128, 256>}, {transform_indices = @transform_3, window_bounds = array<i64: 2, 256>}, {transform_indices = @transform_4, window_bounds = array<i64: 256, 128>}, {pipeline_mode = #tpu.pipeline_mode<synchronous>, transform_indices = @transform_5, window_bounds = array<i64: 1, 128>}, {transform_indices = @transform_6, window_bounds = array<i64: 26, 128>}]} {
    %c0_i32 = arith.constant 0 : i32
    %0 = arith.cmpi eq, %arg1, %c0_i32 : i32
    %1 = arith.extui %0 : i1 to i32
    %c0_i32_0 = arith.constant 0 : i32
    %2 = arith.cmpi ne, %1, %c0_i32_0 : i32
    scf.if %2 {
      %cst_22 = arith.constant 0.000000e+00 : f32
      %31 = vector.broadcast %cst_22 : f32 to vector<26x128xf32>
      %c0_23 = arith.constant 0 : index
      %c0_24 = arith.constant 0 : index
      %32 = vector.load %arg9[%c0_23, %c0_24] : memref<26x128xf32, #tpu.memory_space<vmem>>, vector<26x128xf32>
      tpu.vector_store %arg9[%c0_23, %c0_24], %31 {strides = array<i32>} : memref<26x128xf32, #tpu.memory_space<vmem>>, vector<26x128xf32>,
    } else {
    }
    %c0 = arith.constant 0 : index
    %c0_1 = arith.constant 0 : index
    %3 = vector.load %arg2[%c0, %c0_1] : memref<26x128xf32, #tpu.memory_space<vmem>>, vector<26x128xf32>
    %c0_2 = arith.constant 0 : index
    %c0_3 = arith.constant 0 : index
    %4 = vector.load %arg3[%c0_2, %c0_3] : memref<128x256xf32, #tpu.memory_space<vmem>>, vector<128x256xf32>
    %cst = arith.constant dense<0.000000e+00> : vector<26x256xf32>
    %5 = tpu.matmul %3, %4, %cst {dimension_numbers = #tpu.dot_dimension_numbers<[1], [0], [0], [1], [0, 0, 1, 1], [], []>} : vector<26x128xf32>, vector<128x256xf32>, vector<26x256xf32> -> vector<26x256xf32>
    %c1 = arith.constant 1 : index
    %c0_4 = arith.constant 0 : index
    %6 = vector.load %arg5[%c1, %c0_4] : memref<2x256xf32, #tpu.memory_space<vmem>>, vector<1x256xf32>
    %7 = vector.broadcast %6 : vector<1x256xf32> to vector<26x256xf32>
    %8 = arith.addf %5, %7 : vector<26x256xf32>
    %cst_5 = arith.constant 5.000000e-01 : f32
    %9 = vector.broadcast %cst_5 : f32 to vector<26x256xf32>
    %10 = arith.mulf %9, %8 : vector<26x256xf32>
    %cst_6 = arith.constant 0.707106769 : f32
    %11 = vector.broadcast %cst_6 : f32 to vector<26x256xf32>
    %12 = arith.mulf %8, %11 : vector<26x256xf32>
    %13 = math.erf %12 : vector<26x256xf32>
    %cst_7 = arith.constant 1.000000e+00 : f32
    %14 = vector.broadcast %cst_7 : f32 to vector<26x256xf32>
    %15 = arith.addf %14, %13 : vector<26x256xf32>
    %16 = arith.mulf %10, %15 : vector<26x256xf32>
    %c0_8 = arith.constant 0 : index
    %c0_9 = arith.constant 0 : index
    %17 = vector.load %arg4[%c0_8, %c0_9] : memref<128x256xf32, #tpu.memory_space<vmem>>, vector<128x256xf32>
    %cst_10 = arith.constant dense<0.000000e+00> : vector<26x256xf32>
    %18 = tpu.matmul %3, %17, %cst_10 {dimension_numbers = #tpu.dot_dimension_numbers<[1], [0], [0], [1], [0, 0, 1, 1], [], []>} : vector<26x128xf32>, vector<128x256xf32>, vector<26x256xf32> -> vector<26x256xf32>
    %c0_11 = arith.constant 0 : index
    %c0_12 = arith.constant 0 : index
    %19 = vector.load %arg5[%c0_11, %c0_12] : memref<2x256xf32, #tpu.memory_space<vmem>>, vector<1x256xf32>
    %20 = vector.broadcast %19 : vector<1x256xf32> to vector<26x256xf32>
    %21 = arith.addf %18, %20 : vector<26x256xf32>
    %22 = arith.mulf %16, %21 : vector<26x256xf32>
    %c0_13 = arith.constant 0 : index
    %c0_14 = arith.constant 0 : index
    %23 = vector.load %arg9[%c0_13, %c0_14] : memref<26x128xf32, #tpu.memory_space<vmem>>, vector<26x128xf32>
    %c0_15 = arith.constant 0 : index
    %c0_16 = arith.constant 0 : index
    %24 = vector.load %arg6[%c0_15, %c0_16] : memref<256x128xf32, #tpu.memory_space<vmem>>, vector<256x128xf32>
    %cst_17 = arith.constant dense<0.000000e+00> : vector<26x128xf32>
    %25 = tpu.matmul %22, %24, %cst_17 {dimension_numbers = #tpu.dot_dimension_numbers<[1], [0], [0], [1], [0, 0, 1, 1], [], []>} : vector<26x256xf32>, vector<256x128xf32>, vector<26x128xf32> -> vector<26x128xf32>
    %26 = arith.addf %23, %25 : vector<26x128xf32>
    %c0_18 = arith.constant 0 : index
    %c0_19 = arith.constant 0 : index
    %27 = vector.load %arg9[%c0_18, %c0_19] : memref<26x128xf32, #tpu.memory_space<vmem>>, vector<26x128xf32>
    tpu.vector_store %arg9[%c0_18, %c0_19], %26 {strides = array<i32>} : memref<26x128xf32, #tpu.memory_space<vmem>>, vector<26x128xf32>,
    %c0_i32_20 = arith.constant 0 : i32
    %28 = arith.cmpi eq, %arg1, %c0_i32_20 : i32
    %29 = arith.extui %28 : i1 to i32
    %c0_i32_21 = arith.constant 0 : i32
    %30 = arith.cmpi ne, %29, %c0_i32_21 : i32
    scf.if %30 {
      %c0_22 = arith.constant 0 : index
      %c0_23 = arith.constant 0 : index
      %31 = vector.load %arg9[%c0_22, %c0_23] : memref<26x128xf32, #tpu.memory_space<vmem>>, vector<26x128xf32>
      %c0_24 = arith.constant 0 : index
      %c0_25 = arith.constant 0 : index
      %32 = vector.load %arg7[%c0_24, %c0_25] : memref<1x128xf32, #tpu.memory_space<vmem>>, vector<1x128xf32>
      %33 = vector.broadcast %32 : vector<1x128xf32> to vector<26x128xf32>
      %34 = arith.addf %31, %33 : vector<26x128xf32>
      %c0_26 = arith.constant 0 : index
      %c0_27 = arith.constant 0 : index
      %35 = vector.load %arg8[%c0_26, %c0_27] : memref<26x128xf32, #tpu.memory_space<vmem>>, vector<26x128xf32>
      tpu.vector_store %arg8[%c0_26, %c0_27], %34 {strides = array<i32>} : memref<26x128xf32, #tpu.memory_space<vmem>>, vector<26x128xf32>,
    } else {
    }
    return
  }
  func.func @transform_0(%arg0: i32, %arg1: i32) -> (i32, i32) {
    %c0_i32 = arith.constant 0 : i32
    %c0_i32_0 = arith.constant 0 : i32
    return %arg0, %c0_i32 : i32, i32
  }
  func.func @transform_1(%arg0: i32, %arg1: i32) -> (i32, i32) {
    %c0_i32 = arith.constant 0 : i32
    %c0_i32_0 = arith.constant 0 : i32
    return %c0_i32, %arg1 : i32, i32
  }
  func.func @transform_2(%arg0: i32, %arg1: i32) -> (i32, i32) {
    %c0_i32 = arith.constant 0 : i32
    %c0_i32_0 = arith.constant 0 : i32
    return %c0_i32, %arg1 : i32, i32
  }
  func.func @transform_3(%arg0: i32, %arg1: i32) -> (i32, i32) {
    %c0_i32 = arith.constant 0 : i32
    %c0_i32_0 = arith.constant 0 : i32
    return %c0_i32, %arg1 : i32, i32
  }
  func.func @transform_4(%arg0: i32, %arg1: i32) -> (i32, i32) {
    %c0_i32 = arith.constant 0 : i32
    %c0_i32_0 = arith.constant 0 : i32
    return %arg1, %c0_i32 : i32, i32
  }
  func.func @transform_5(%arg0: i32, %arg1: i32) -> (i32, i32) {
    %c0_i32 = arith.constant 0 : i32
    %c0_i32_0 = arith.constant 0 : i32
    %c0_i32_1 = arith.constant 0 : i32
    return %c0_i32, %c0_i32_0 : i32, i32
  }
  func.func @transform_6(%arg0: i32, %arg1: i32) -> (i32, i32) {
    %c0_i32 = arith.constant 0 : i32
    %c0_i32_0 = arith.constant 0 : i32
    return %arg0, %c0_i32 : i32, i32
  }
}

</mosaic_0001>

<bundles_post_ra>
// kernel: tpu_custom_call.1
= control target key start
LH: loop header
LB: loop body
LE: loop exit
PB: predicated region body
PF: predicated region fallthrough
CT: control target
= control target key end

     0   :  { %11 = vsyncpa [#allocation4], 0  ;;  %s1023_s0 = inlined_call_operand.hbm [shape: f32[26,128], index: 0, kind: input, shape index: {}]   ;;  %s1024_s1 = inlined_call_operand.hbm [shape: f32[128,256], index: 1, kind: input, shape index: {}]   ;;  %s1025_s2 = inlined_call_operand.hbm [shape: f32[128,256], index: 2, kind: input, shape index: {}]   ;;  %s1026_s3 = inlined_call_operand.vmem [shape: f32[2,256], index: 3, kind: input, shape index: {}]   ;;  %s1027_s4 = inlined_call_operand.hbm [shape: f32[256,128], index: 4, kind: input, shape index: {}]   ;;  %s1028_s5 = inlined_call_operand.vmem [shape: f32[1,128], index: 5, kind: input, shape index: {}]   ;;  %s1029_s6 = inlined_call_operand.hbm [shape: f32[26,128], index: 6, kind: output, shape index: {}]  }
   0x1   :  { %12 = vsyncpa [#allocation7], 0 }
   0x2   :  { %13 = vsyncpa [#allocation10], 0 }
   0x3   :  { %14 = vsyncpa [#allocation5], 0  ;;  %s878_s21 = smov [#allocation6]   ;;  %s760_s25 = scalar_lea.hbm %s1024_s1, 4096 }
   0x4   :  { %s32_s22 = sshll.u32 %s878_s21, 4  ;;  %p761_p0 = scmp.ne.s32.totalorder %s1024_s1, %s760_s25  ;;  %s33_s22 = int_to_ptr.vmem [resolvable:$true] %s32_s22 }
   0x5   :  { %p764_p1 = scmp.lt.u32.totalorder %s760_s25, %s1024_s1 }
   0x7   :  { %p766_p2 = pnand %p764_p1, %p761_p0 }
   0x9   :  { %769 = shalt.err (!%p766_p2)
}
   0xa   :  { %s770_s30 = scalar_lea.vmem %s33_s22, 4096  ;;  %p775_p4 = scmp.lt.s32.totalorder %s33_s22, %s33_s22 }
   0xb   :  { %p771_p3 = scmp.ne.s32.totalorder %s33_s22, %s770_s30  ;;  %p776_p5 = scmp.lt.s32.totalorder %s770_s30, %s770_s30 }
   0xd   :  { %p777_p6 = por %p776_p5, %p775_p4 }
   0xf   :  { %p778_p7 = pnand %p777_p6, %p771_p3 }
  0x11   :  { %781 = shalt.err (!%p778_p7)
}
  0x12   :  { %s879_s7 = smov 256   ;;  %s880_s8 = smov 16  }
  0x13   :  { %38 = dma.hbm_to_vmem [thread:$0]  %s1024_s1, 4096, %s33_s22, [#allocation7], %s879_s7, %s879_s7, %s880_s8  }
  0x14   :  { %s881_s11 = smov [#allocation3]   ;;  %s782_s15 = scalar_lea.hbm %s1023_s0, 512 }
  0x15   :  { %s20_s12 = sshll.u32 %s881_s11, 4  ;;  %p783_p8 = scmp.ne.s32.totalorder %s1023_s0, %s782_s15  ;;  %s21_s12 = int_to_ptr.vmem [resolvable:$true] %s20_s12 }
  0x16   :  { %p786_p9 = scmp.lt.u32.totalorder %s782_s15, %s1023_s0 }
  0x18   :  { %p788_p10 = pnand %p786_p9, %p783_p8 }
  0x1a   :  { %791 = shalt.err (!%p788_p10)
}
  0x1b   :  { %s792_s20 = scalar_lea.vmem %s21_s12, 512  ;;  %p797_p12 = scmp.lt.s32.totalorder %s21_s12, %s21_s12 }
  0x1c   :  { %p793_p11 = scmp.ne.s32.totalorder %s21_s12, %s792_s20  ;;  %p798_p13 = scmp.lt.s32.totalorder %s792_s20, %s792_s20 }
  0x1e   :  { %p799_p0 = por %p798_p13, %p797_p12 }
  0x20   :  { %p800_p1 = pnand %p799_p0, %p793_p11 }
  0x22   :  { %803 = shalt.err (!%p800_p1)
}
  0x23   :  { %s882_s1 = smov 128   ;;  %s883_s21 = smov 8  }
  0x24   :  { %26 = dma.hbm_to_vmem [thread:$0]  %s1023_s0, 512, %s21_s12, [#allocation4], %s882_s1, %s882_s1, %s883_s21  }
  0x25   :  { %s884_s24 = smov [#allocation8]   ;;  %s885_s26 = smov [#allocation9]  }
  0x26   :  { %s44_s25 = sshll.u32 %s884_s24, 4  ;;  %s58_s27 = sshll.u32 %s885_s26, 4  ;;  %s45_s25 = int_to_ptr.vmem [resolvable:$true] %s44_s25  ;;  %s953_s27 = int_to_ptr.vmem [resolvable:$true] %s58_s27 }
  0x27   :  { %s804_s30 = scalar_lea.hbm %s1025_s2, 4096 }
  0x28   :  { %p805_p2 = scmp.ne.s32.totalorder %s1025_s2, %s804_s30  ;;  %p808_p3 = scmp.lt.u32.totalorder %s804_s30, %s1025_s2 }
  0x2a   :  { %p810_p4 = pnand %p808_p3, %p805_p2 }
  0x2c   :  { %813 = shalt.err (!%p810_p4)
}
  0x2d   :  { %s814_s0 = scalar_lea.vmem %s45_s25, 4096  ;;  %p819_p6 = scmp.lt.s32.totalorder %s45_s25, %s45_s25 }
  0x2e   :  { %p815_p5 = scmp.ne.s32.totalorder %s45_s25, %s814_s0  ;;  %p820_p7 = scmp.lt.s32.totalorder %s814_s0, %s814_s0 }
  0x30   :  { %p821_p8 = por %p820_p7, %p819_p6 }
  0x32   :  { %p822_p9 = pnand %p821_p8, %p815_p5 }
  0x34   :  { %825 = shalt.err (!%p822_p9)
}
  0x35   :  { %50 = dma.hbm_to_vmem [thread:$0]  %s1025_s2, 4096, %s45_s25, [#allocation7], %s879_s7, %s879_s7, %s880_s8  }
  0x36   :  { %s826_s17 = scalar_lea.hbm %s1027_s4, 4096 }
  0x37   :  { %p827_p10 = scmp.ne.s32.totalorder %s1027_s4, %s826_s17  ;;  %p830_p11 = scmp.lt.u32.totalorder %s826_s17, %s1027_s4 }
  0x39   :  { %p832_p12 = pnand %p830_p11, %p827_p10 }
  0x3b   :  { %835 = shalt.err (!%p832_p12)
}
  0x3c   :  { %s836_s23 = scalar_lea.vmem %s953_s27, 4096  ;;  %p841_p0 = scmp.lt.s32.totalorder %s953_s27, %s953_s27 }
  0x3d   :  { %p837_p13 = scmp.ne.s32.totalorder %s953_s27, %s836_s23  ;;  %p842_p1 = scmp.lt.s32.totalorder %s836_s23, %s836_s23 }
  0x3f   :  { %p843_p2 = por %p842_p1, %p841_p0 }
  0x41   :  { %p844_p3 = pnand %p843_p2, %p837_p13 }
  0x43   :  { %847 = shalt.err (!%p844_p3)
}
  0x44   :  { %64 = dma.hbm_to_vmem [thread:$0]  %s1027_s4, 4096, %s953_s27, [#allocation10], %s882_s1, %s882_s1, %s883_s21  }
  0x45   :  { %870 = dma.done.wait [#allocation4], 512  }
  0x46   :  { %871 = vsyncadd [#allocation4], 4294966784 }
  0x47   :  { %872 = dma.done.wait [#allocation7], 8192  }
  0x48   :  { %873 = vsyncadd [#allocation7], 4294959104 }
  0x49   :  { %874 = dma.done.wait [#allocation10], 4096  }
  0x4a   :  { %875 = vsyncadd [#allocation10], 4294963200  ;;  %v886_v0 = vmov 0.0   ;;  %v92_v1 = vld [vmem:[#allocation6 + $0x8] sm:$0xff]  ;;  %v94_v2 = vld [vmem:[#allocation6 + $0x18] sm:$0xff]  ;;  %s887_s27 = smov [#allocation11]  }
  0x4b   :  { %200 = vmatprep.mubr.f32.mxu0 %v886_v0  ;;  %86 = vst [vmem:[#allocation2 + $0x18] sm:$0x3] %v886_v0  ;;  %373 = vmatprep.mubr.f32.mxu1 %v886_v0  ;;  %v91_v3 = vld [vmem:[#allocation6] sm:$0xff]  ;;  %v622_v4 = vpack.c.bf16 %v94_v2, %v92_v1  ;;  %v93_v5 = vld [vmem:[#allocation6 + $0x10] sm:$0xff]  ;;  %v96_v6 = vld [vmem:[#allocation6 + $0x28] sm:$0xff] }
  0x4c   :  { %v98_v7 = vld [vmem:[#allocation6 + $0x38] sm:$0xff]  ;;  %v624_v8 = vpack.c.bf16 %v93_v5, %v91_v3  ;;  %v95_v10 = vld [vmem:[#allocation6 + $0x20] sm:$0xff]  ;;  %v97_v11 = vld [vmem:[#allocation6 + $0x30] sm:$0xff] }
  0x4d   :  { %v626_v9 = vpack.c.bf16 %v98_v7, %v96_v6  ;;  %v100_v12 = vld [vmem:[#allocation6 + $0x48] sm:$0xff]  ;;  %623 = vmatprep.subr.bf16.mxu0 %v622_v4  ;;  %v102_v13 = vld [vmem:[#allocation6 + $0x58] sm:$0xff]  ;;  %v628_v14 = vpack.c.bf16 %v97_v11, %v95_v10  ;;  %v99_v16 = vld [vmem:[#allocation6 + $0x40] sm:$0xff] }
  0x4e   :  { %625 = vmatpush1.bf16.msra.mxu0 %v624_v8  ;;  %v630_v15 = vpack.c.bf16 %v102_v13, %v100_v12  ;;  %v101_v17 = vld [vmem:[#allocation6 + $0x50] sm:$0xff]  ;;  %v104_v18 = vld [vmem:[#allocation6 + $0x68] sm:$0xff]  ;;  %v106_v19 = vld [vmem:[#allocation6 + $0x78] sm:$0xff] }
  0x4f   :  { %627 = vmatprep.subr.bf16.mxu0 %v626_v9  ;;  %v266_v20 = vld [vmem:[#allocation8 + $0x8] sm:$0xff]  ;;  %v268_v21 = vld [vmem:[#allocation8 + $0x18] sm:$0xff]  ;;  %v265_v23 = vld [vmem:[#allocation8] sm:$0xff]  ;;  %v632_v25 = vpack.c.bf16 %v101_v17, %v99_v16  ;;  %v634_v29 = vpack.c.bf16 %v106_v19, %v104_v18 }
  0x50   :  { %v654_v22 = vpack.c.bf16 %v268_v21, %v266_v20  ;;  %v267_v24 = vld [vmem:[#allocation8 + $0x10] sm:$0xff]  ;;  %v103_v26 = vld [vmem:[#allocation6 + $0x60] sm:$0xff]  ;;  %v270_v28 = vld [vmem:[#allocation8 + $0x28] sm:$0xff] }
  0x51   :  { %v656_v27 = vpack.c.bf16 %v267_v24, %v265_v23  ;;  %v105_v30 = vld [vmem:[#allocation6 + $0x70] sm:$0xff]  ;;  %v108_v31 = vld [vmem:[#allocation6 + $0x88] sm:$0xff]  ;;  %v272_v32 = vld [vmem:[#allocation8 + $0x38] sm:$0xff] }
  0x52   :  { %629 = vmatpush1.bf16.msra.mxu0 %v628_v14  ;;  %655 = vmatprep.subr.bf16.mxu1 %v654_v22  ;;  %v110_v33 = vld [vmem:[#allocation6 + $0x98] sm:$0xff]  ;;  %v658_v34 = vpack.c.bf16 %v272_v32, %v270_v28  ;;  %v269_v35 = vld [vmem:[#allocation8 + $0x20] sm:$0xff]  ;;  %v271_v36 = vld [vmem:[#allocation8 + $0x30] sm:$0xff]  ;;  %v636_v40 = vpack.c.bf16 %v105_v30, %v103_v26 }
  0x53   :  { %631 = vmatprep.subr.bf16.mxu0 %v630_v15  ;;  %657 = vmatpush1.bf16.msra.mxu1 %v656_v27  ;;  %v660_v37 = vpack.c.bf16 %v271_v36, %v269_v35  ;;  %v274_v38 = vld [vmem:[#allocation8 + $0x48] sm:$0xff]  ;;  %v276_v39 = vld [vmem:[#allocation8 + $0x58] sm:$0xff]  ;;  %v107_v41 = vld [vmem:[#allocation6 + $0x80] sm:$0xff]  ;;  %v638_v44 = vpack.c.bf16 %v110_v33, %v108_v31 }
  0x54   :  { %659 = vmatprep.subr.bf16.mxu1 %v658_v34  ;;  %v662_v42 = vpack.c.bf16 %v276_v39, %v274_v38  ;;  %v273_v43 = vld [vmem:[#allocation8 + $0x40] sm:$0xff]  ;;  %v109_v45 = vld [vmem:[#allocation6 + $0x90] sm:$0xff]  ;;  %v112_v46 = vld [vmem:[#allocation6 + $0xa8] sm:$0xff] }
  0x55   :  { %v275_v47 = vld [vmem:[#allocation8 + $0x50] sm:$0xff]  ;;  %v114_v48 = vld [vmem:[#allocation6 + $0xb8] sm:$0xff]  ;;  %v278_v50 = vld [vmem:[#allocation8 + $0x68] sm:$0xff]  ;;  %v640_v55 = vpack.c.bf16 %v109_v45, %v107_v41 }
  0x56   :  { %633 = vmatpush1.bf16.msra.mxu0 %v632_v25  ;;  %v664_v49 = vpack.c.bf16 %v275_v47, %v273_v43  ;;  %v280_v51 = vld [vmem:[#allocation8 + $0x78] sm:$0xff]  ;;  %v277_v53 = vld [vmem:[#allocation8 + $0x60] sm:$0xff]  ;;  %v279_v54 = vld [vmem:[#allocation8 + $0x70] sm:$0xff]  ;;  %v642_v58 = vpack.c.bf16 %v114_v48, %v112_v46 }
  0x57   :  { %635 = vmatprep.subr.bf16.mxu0 %v634_v29  ;;  %661 = vmatpush1.bf16.msra.mxu1 %v660_v37  ;;  %v666_v52 = vpack.c.bf16 %v280_v51, %v278_v50  ;;  %v282_v56 = vld [vmem:[#allocation8 + $0x88] sm:$0xff]  ;;  %v284_v57 = vld [vmem:[#allocation8 + $0x98] sm:$0xff]  ;;  %v111_v59 = vld [vmem:[#allocation6 + $0xa0] sm:$0xff]  ;;  %v668_v63 = vpack.c.bf16 %v279_v54, %v277_v53 }
  0x58   :  { %663 = vmatprep.subr.bf16.mxu1 %v662_v42  ;;  %v113_v60 = vld [vmem:[#allocation6 + $0xb0] sm:$0xff]  ;;  %v116_v61 = vld [vmem:[#allocation6 + $0xc8] sm:$0xff]  ;;  %v118_v62 = vld [vmem:[#allocation6 + $0xd8] sm:$0xff]  ;;  %v670_v1 = vpack.c.bf16 %v284_v57, %v282_v56 }
  0x59   :  { %v281_v2 = vld [vmem:[#allocation8 + $0x80] sm:$0xff]  ;;  %v283_v3 = vld [vmem:[#allocation8 + $0x90] sm:$0xff]  ;;  %v644_v4 = vpack.c.bf16 %v113_v60, %v111_v59  ;;  %v286_v5 = vld [vmem:[#allocation8 + $0xa8] sm:$0xff]  ;;  %v646_v7 = vpack.c.bf16 %v118_v62, %v116_v61 }
  0x5a   :  { %637 = vmatpush1.bf16.msra.mxu0 %v636_v40  ;;  %v288_v6 = vld [vmem:[#allocation8 + $0xb8] sm:$0xff]  ;;  %v115_v8 = vld [vmem:[#allocation6 + $0xc0] sm:$0xff]  ;;  %v117_v9 = vld [vmem:[#allocation6 + $0xd0] sm:$0xff]  ;;  %v672_v12 = vpack.c.bf16 %v283_v3, %v281_v2 }
  0x5b   :  { %639 = vmatprep.subr.bf16.mxu0 %v638_v44  ;;  %665 = vmatpush1.bf16.msra.mxu1 %v664_v49  ;;  %v120_v10 = vld [vmem:[#allocation6 + $0xe8] sm:$0xff]  ;;  %v122_v11 = vld [vmem:[#allocation6 + $0xf8] sm:$0xff]  ;;  %v674_v13 = vpack.c.bf16 %v288_v6, %v286_v5  ;;  %v285_v14 = vld [vmem:[#allocation8 + $0xa0] sm:$0xff]  ;;  %v648_v16 = vpack.c.bf16 %v117_v9, %v115_v8 }
  0x5c   :  { %667 = vmatprep.subr.bf16.mxu1 %v666_v52  ;;  %v287_v15 = vld [vmem:[#allocation8 + $0xb0] sm:$0xff]  ;;  %v290_v17 = vld [vmem:[#allocation8 + $0xc8] sm:$0xff]  ;;  %v292_v18 = vld [vmem:[#allocation8 + $0xd8] sm:$0xff]  ;;  %v650_v19 = vpack.c.bf16 %v122_v11, %v120_v10 }
  0x5d   :  { %v119_v20 = vld [vmem:[#allocation6 + $0xe0] sm:$0xff]  ;;  %v121_v21 = vld [vmem:[#allocation6 + $0xf0] sm:$0xff]  ;;  %v676_v22 = vpack.c.bf16 %v287_v15, %v285_v14  ;;  %v427_v24 = vld [vmem:[#allocation9 + $0x88] sm:$0xff]  ;;  %v678_v25 = vpack.c.bf16 %v292_v18, %v290_v17 }
  0x5e   :  { %641 = vmatpush1.bf16.msra.mxu0 %v640_v55  ;;  %v426_v23 = vld [vmem:[#allocation9 + $0x80] sm:$0xff]  ;;  %v291_v27 = vld [vmem:[#allocation8 + $0xd0] sm:$0xff]  ;;  %v652_v28 = vpack.c.bf16 %v121_v21, %v119_v20  ;;  %v294_v29 = vld [vmem:[#allocation8 + $0xe8] sm:$0xff] }
  0x5f   :  { %643 = vmatprep.subr.bf16.mxu0 %v642_v58  ;;  %669 = vmatpush1.bf16.msra.mxu1 %v668_v63  ;;  %v289_v26 = vld [vmem:[#allocation8 + $0xc0] sm:$0xff]  ;;  %v296_v30 = vld [vmem:[#allocation8 + $0xf8] sm:$0xff]  ;;  %v686_v31 = vpack.c.bf16 %v427_v24, %v426_v23  ;;  %v411_v33 = vld [vmem:[#allocation9 + $0x8] sm:$0xff] }
  0x60   :  { %671 = vmatprep.subr.bf16.mxu1 %v670_v1  ;;  %v410_v32 = vld [vmem:[#allocation9] sm:$0xff]  ;;  %v680_v34 = vpack.c.bf16 %v291_v27, %v289_v26  ;;  %v428_v35 = vld [vmem:[#allocation9 + $0x90] sm:$0xff]  ;;  %v429_v36 = vld [vmem:[#allocation9 + $0x98] sm:$0xff]  ;;  %v682_v37 = vpack.c.bf16 %v296_v30, %v294_v29 }
  0x61   :  { %v293_v38 = vld [vmem:[#allocation8 + $0xe0] sm:$0xff]  ;;  %v295_v39 = vld [vmem:[#allocation8 + $0xf0] sm:$0xff]  ;;  %v688_v41 = vpack.c.bf16 %v411_v33, %v410_v32  ;;  %v690_v42 = vpack.c.bf16 %v429_v36, %v428_v35  ;;  %v413_v44 = vld [vmem:[#allocation9 + $0x18] sm:$0xff] }
  0x62   :  { %645 = vmatpush1.bf16.msra.mxu0 %v644_v4  ;;  %v87_v40 = vld [vmem:[#allocation3] sm:$0xff]  ;;  %v412_v43 = vld [vmem:[#allocation9 + $0x10] sm:$0xff]  ;;  %v684_v45 = vpack.c.bf16 %v295_v39, %v293_v38  ;;  %v88_v46 = vld [vmem:[#allocation3 + $0x8] sm:$0xff] }
  0x63   :  { %647 = vmatprep.subr.bf16.mxu0 %v646_v7  ;;  %673 = vmatpush1.bf16.msra.mxu1 %v672_v12  ;;  %v692_v47 = vpack.c.bf16 %v413_v44, %v412_v43  ;;  %v89_v48 = vld [vmem:[#allocation3 + $0x10] sm:$0xff]  ;;  %v90_v49 = vld [vmem:[#allocation3 + $0x18] sm:$0x3]  ;;  %v430_v50 = vld [vmem:[#allocation9 + $0xa0] sm:$0xff] }
  0x64   :  { %675 = vmatprep.subr.bf16.mxu1 %v674_v13  ;;  %v431_v51 = vld [vmem:[#allocation9 + $0xa8] sm:$0xff]  ;;  %v414_v53 = vld [vmem:[#allocation9 + $0x20] sm:$0xff]  ;;  %v432_v56 = vld [vmem:[#allocation9 + $0xb0] sm:$0xff] }
  0x65   :  { %v694_v52 = vpack.c.bf16 %v431_v51, %v430_v50  ;;  %v415_v54 = vld [vmem:[#allocation9 + $0x28] sm:$0xff]  ;;  %v433_v57 = vld [vmem:[#allocation9 + $0xb8] sm:$0xff]  ;;  %v416_v59 = vld [vmem:[#allocation9 + $0x30] sm:$0xff] }
  0x66   :  { %649 = vmatpush1.bf16.msra.mxu0 %v648_v16  ;;  %v696_v55 = vpack.c.bf16 %v415_v54, %v414_v53  ;;  %v698_v58 = vpack.c.bf16 %v433_v57, %v432_v56  ;;  %v417_v60 = vld [vmem:[#allocation9 + $0x38] sm:$0xff]  ;;  %v435_v62 = vld [vmem:[#allocation9 + $0xc8] sm:$0xff]  ;;  %v418_v1 = vld [vmem:[#allocation9 + $0x40] sm:$0xff] }
  0x67   :  { %651 = vmatprep.subr.bf16.mxu0 %v650_v19  ;;  %677 = vmatpush1.bf16.msra.mxu1 %v676_v22  ;;  %v700_v61 = vpack.c.bf16 %v417_v60, %v416_v59  ;;  %v419_v2 = vld [vmem:[#allocation9 + $0x48] sm:$0xff]  ;;  %v436_v4 = vld [vmem:[#allocation9 + $0xd0] sm:$0xff]  ;;  %v437_v5 = vld [vmem:[#allocation9 + $0xd8] sm:$0xff]  ;;  %v126_v22 = vlaneseq }
  0x68   :  { %679 = vmatprep.subr.bf16.mxu1 %v678_v25  ;;  %v704_v3 = vpack.c.bf16 %v419_v2, %v418_v1  ;;  %v706_v6 = vpack.c.bf16 %v437_v5, %v436_v4  ;;  %v420_v7 = vld [vmem:[#allocation9 + $0x50] sm:$0xff]  ;;  %v421_v8 = vld [vmem:[#allocation9 + $0x58] sm:$0xff]  ;;  %v438_v10 = vld [vmem:[#allocation9 + $0xe0] sm:$0xff] }
  0x69   :  { %v708_v9 = vpack.c.bf16 %v421_v8, %v420_v7  ;;  %v439_v11 = vld [vmem:[#allocation9 + $0xe8] sm:$0xff]  ;;  %v422_v13 = vld [vmem:[#allocation9 + $0x60] sm:$0xff]  ;;  %v440_v16 = vld [vmem:[#allocation9 + $0xf0] sm:$0xff]  ;;  %v127_v23 = vshrl.u32 %v126_v22, 7 }
  0x6a   :  { %653 = vmatpush1.bf16.msra.mxu0 %v652_v28  ;;  %v710_v12 = vpack.c.bf16 %v439_v11, %v438_v10  ;;  %v423_v14 = vld [vmem:[#allocation9 + $0x68] sm:$0xff]  ;;  %v441_v17 = vld [vmem:[#allocation9 + $0xf8] sm:$0xff]  ;;  %v424_v19 = vld [vmem:[#allocation9 + $0x70] sm:$0xff] }
  0x6b   :  { %687 = vmatprep.subr.bf16.mxu0 %v686_v31  ;;  %681 = vmatpush1.bf16.msra.mxu1 %v680_v34  ;;  %v712_v15 = vpack.c.bf16 %v423_v14, %v422_v13  ;;  %v714_v18 = vpack.c.bf16 %v441_v17, %v440_v16  ;;  %v425_v20 = vld [vmem:[#allocation9 + $0x78] sm:$0xff]  ;;  %v128_v24 = vsub.s32 0, %v127_v23  ;;  %v576_v25 = vld [vmem:[%s1026_s3 + $0x1] ss:$2 sm:$0x3]  ;;  %v132_v26 = vsub.s32 1, %v127_v23 }
  0x6c   :  { %683 = vmatprep.subr.bf16.mxu1 %v682_v37  ;;  %v716_v21 = vpack.c.bf16 %v425_v20, %v424_v19 }
  0x6d   :  { %201 = vmatmul.mubr.f32.vlgmr.msra.gmra.mrb[0].mxu0 %v87_v40  ;;  %v129_v27 = vrot.slane %v576_v25, %v128_v24  ;;  %v133_v28 = vrot.slane %v576_v25, %v132_v26 }
  0x6e   :  { %206 = vmatprep.mubr.f32.mxu0 %v886_v0  ;;  %689 = vmatpush3.bf16.msra.mxu0 %v688_v41 }
  0x6f   :  { %691 = vmatprep.subr.bf16.mxu0 %v690_v42  ;;  %685 = vmatpush1.bf16.msra.mxu1 %v684_v45 }
  0x70   :  { %718 = vmatprep.subr.bf16.mxu1 %v686_v31 }
  0x71   :  { %207 = vmatmul.mubr.f32.gmra.mrb[2].mxu0 %v88_v46 }
  0x72   :  { %212 = vmatprep.mubr.f32.mxu0 %v886_v0  ;;  %693 = vmatpush3.bf16.msra.mxu0 %v692_v47 }
  0x73   :  { %374 = vmatmul.mubr.f32.vlgmr.msra.gmra.mrb[0].mxu1 %v87_v40  ;;  %695 = vmatprep.subr.bf16.mxu0 %v694_v52 }
  0x74   :  { %379 = vmatprep.mubr.f32.mxu1 %v886_v0  ;;  %726 = vmatpush3.bf16.msra.mxu1 %v688_v41 }
  0x75   :  { %213 = vmatmul.mubr.f32.gmra.mrb[4].mxu0 %v89_v48  ;;  %719 = vmatprep.subr.bf16.mxu1 %v690_v42 }
  0x76   :  { %218 = vmatprep.mubr.f32.mxu0 %v886_v0  ;;  %697 = vmatpush3.bf16.msra.mxu0 %v696_v55 }
  0x77   :  { %380 = vmatmul.mubr.f32.gmra.mrb[2].mxu1 %v88_v46  ;;  %699 = vmatprep.subr.bf16.mxu0 %v698_v58  ;;  %v297_v46 = vld [vmem:[%s1026_s3] ss:$2 sm:$0x3] }
  0x78   :  { %385 = vmatprep.mubr.f32.mxu1 %v886_v0  ;;  %727 = vmatpush3.bf16.msra.mxu1 %v692_v47  ;;  %v302_v53 = vrot.slane %v297_v46, %v128_v24  ;;  %v306_v56 = vrot.slane %v297_v46, %v132_v26 }
  0x79   :  { %219 = vmatmul.mubr.f32.gmra.mrb[6].mxu0 %v90_v49  ;;  %720 = vmatprep.subr.bf16.mxu1 %v694_v52 }
  0x7a   :  { %701 = vmatpush3.bf16.msra.mxu0 %v700_v61 }
  0x7b   :  { %386 = vmatmul.mubr.f32.gmra.mrb[4].mxu1 %v89_v48 }
  0x7c   :  { %391 = vmatprep.mubr.f32.mxu1 %v886_v0  ;;  %728 = vmatpush3.bf16.msra.mxu1 %v696_v55  ;;  %v434_v0 = vld [vmem:[#allocation9 + $0xc0] sm:$0xff] }
  0x7d   :  { %721 = vmatprep.subr.bf16.mxu1 %v698_v58  ;;  %v702_v63 = vpack.c.bf16 %v435_v62, %v434_v0 }
  0x7f   :  { %392 = vmatmul.mubr.f32.gmra.mrb[6].mxu1 %v90_v49  ;;  %703 = vmatprep.subr.bf16.mxu0 %v702_v63 }
  0x80   :  { %729 = vmatpush3.bf16.msra.mxu1 %v700_v61  ;;  %705 = vmatpush3.bf16.msra.mxu0 %v704_v3 }
  0x81   :  { %722 = vmatprep.subr.bf16.mxu1 %v702_v63  ;;  %707 = vmatprep.subr.bf16.mxu0 %v706_v6 }
  0x84   :  { %730 = vmatpush3.bf16.msra.mxu1 %v704_v3  ;;  %709 = vmatpush3.bf16.msra.mxu0 %v708_v9 }
  0x85   :  { %723 = vmatprep.subr.bf16.mxu1 %v706_v6  ;;  %711 = vmatprep.subr.bf16.mxu0 %v710_v12 }
  0x88   :  { %731 = vmatpush3.bf16.msra.mxu1 %v708_v9  ;;  %713 = vmatpush3.bf16.msra.mxu0 %v712_v15 }
  0x89   :  { %724 = vmatprep.subr.bf16.mxu1 %v710_v12  ;;  %715 = vmatprep.subr.bf16.mxu0 %v714_v18 }
  0x8c   :  { %732 = vmatpush3.bf16.msra.mxu1 %v712_v15  ;;  %717 = vmatpush3.bf16.msra.mxu0 %v716_v21 }
  0x8d   :  { %725 = vmatprep.subr.bf16.mxu1 %v714_v18 }
  0x90   :  { %733 = vmatpush3.bf16.msra.mxu1 %v716_v21 }
 0x140   :  { %v202_v29 = vpop.f32.mrb[0].mxu0 }
 0x141   :  { %v203_v30 = vadd.f32 %v202_v29, %v129_v27  ;;  %v204_v31 = vpop.f32.mrb[1].mxu0 }
 0x142   :  { %v205_v32 = vadd.f32 %v204_v31, %v133_v28 }
 0x143   :  { %v233_v33 = vmul.f32 0.70710677, %v203_v30  ;;  %v225_v62 = vmul.f32 0.5, %v203_v30 }
 0x144   :  { %v234_v34 = vmul.f32 0.70710677, %v205_v32  ;;  %v208_v35 = vpop.f32.mrb[2].mxu0  ;;  %v226_v3 = vmul.f32 0.5, %v205_v32 }
 0x145   :  { %744 = verf.f32 %v233_v33  ;;  %v209_v36 = vadd.f32 %v208_v35, %v129_v27  ;;  %v210_v37 = vpop.f32.mrb[3].mxu0 }
 0x146   :  { %746 = verf.f32 %v234_v34  ;;  %v211_v38 = vadd.f32 %v210_v37, %v133_v28  ;;  %v375_v39 = vpop.f32.mrb[0].mxu1 }
 0x147   :  { %v235_v40 = vmul.f32 0.70710677, %v209_v36  ;;  %v377_v41 = vpop.f32.mrb[1].mxu1  ;;  %v376_v2 = vadd.f32 %v375_v39, %v302_v53  ;;  %v227_v12 = vmul.f32 0.5, %v209_v36 }
 0x148   :  { %v236_v42 = vmul.f32 0.70710677, %v211_v38  ;;  %v214_v43 = vpop.f32.mrb[4].mxu0  ;;  %v378_v5 = vadd.f32 %v377_v41, %v306_v56  ;;  %v228_v16 = vmul.f32 0.5, %v211_v38 }
 0x149   :  { %748 = verf.f32 %v235_v40  ;;  %v215_v44 = vadd.f32 %v214_v43, %v129_v27  ;;  %v216_v45 = vpop.f32.mrb[5].mxu0 }
 0x14a   :  { %750 = verf.f32 %v236_v42  ;;  %v217_v47 = vadd.f32 %v216_v45, %v133_v28  ;;  %v381_v48 = vpop.f32.mrb[2].mxu1 }
 0x14b   :  { %v237_v49 = vmul.f32 0.70710677, %v215_v44  ;;  %v383_v50 = vpop.f32.mrb[3].mxu1  ;;  %v382_v15 = vadd.f32 %v381_v48, %v302_v53  ;;  %v229_v24 = vmul.f32 0.5, %v215_v44 }
 0x14c   :  { %v238_v51 = vmul.f32 0.70710677, %v217_v47  ;;  %v220_v52 = vpop.f32.mrb[6].mxu0  ;;  %v384_v19 = vadd.f32 %v383_v50, %v306_v56 }
 0x14d   :  { %752 = verf.f32 %v237_v49  ;;  %v221_v54 = vadd.f32 %v220_v52, %v129_v27  ;;  %v222_v55 = vpop.f32.mrb[7].mxu0 }
 0x14e   :  { %754 = verf.f32 %v238_v51  ;;  %v223_v57 = vadd.f32 %v222_v55, %v133_v28  ;;  %v387_v58 = vpop.f32.mrb[4].mxu1  ;;  %v230_v28 = vmul.f32 0.5, %v217_v47  ;;  %v577_v51 = vld [vmem:[%s1028_s5] ss:$0 sm:$0xff]  ;;  %s562_s5 = sshll.u32 %s887_s27, 4  ;;  %s563_s5 = int_to_ptr.vmem [resolvable:$true] %s562_s5 }
 0x14f   :  { %v745_v59 = vpop.eup %744  ;;  %v239_v60 = vmul.f32 0.70710677, %v221_v54  ;;  %v389_v61 = vpop.f32.mrb[5].mxu1  ;;  %v388_v27 = vadd.f32 %v387_v58, %v302_v53  ;;  %v231_v36 = vmul.f32 0.5, %v221_v54  ;;  %s848_s28 = scalar_lea.vmem %s563_s5, 512  ;;  %p853_p5 = scmp.lt.s32.totalorder %s563_s5, %s563_s5 }
 0x150   :  { %v747_v0 = vpop.eup %746  ;;  %v249_v63 = vadd.f32 1.0, %v745_v59  ;;  %v240_v1 = vmul.f32 0.70710677, %v223_v57  ;;  %v390_v31 = vadd.f32 %v389_v61, %v306_v56  ;;  %v232_v40 = vmul.f32 0.5, %v223_v57  ;;  %v409_v61 = vld [vmem:[#allocation2 + $0x18] sm:$0x3]  ;;  %p849_p4 = scmp.ne.s32.totalorder %s563_s5, %s848_s28  ;;  %p854_p6 = scmp.lt.s32.totalorder %s848_s28, %s848_s28 }
 0x151   :  { %v250_v4 = vadd.f32 1.0, %v747_v0  ;;  %756 = verf.f32 %v239_v60 }
 0x152   :  { %758 = verf.f32 %v240_v1  ;;  %v257_v6 = vmul.f32 %v249_v63, %v225_v62  ;;  %v393_v7 = vpop.f32.mrb[6].mxu1  ;;  %p855_p7 = por %p854_p6, %p853_p5 }
 0x153   :  { %v749_v8 = vpop.eup %748  ;;  %v258_v9 = vmul.f32 %v250_v4, %v226_v3  ;;  %v395_v10 = vpop.f32.mrb[7].mxu1  ;;  %v394_v39 = vadd.f32 %v393_v7, %v302_v53 }
 0x154   :  { %v751_v11 = vpop.eup %750  ;;  %v251_v13 = vadd.f32 1.0, %v749_v8  ;;  %v398_v14 = vmul.f32 %v376_v2, %v257_v6  ;;  %v396_v43 = vadd.f32 %v395_v10, %v306_v56  ;;  %p856_p8 = pnand %p855_p7, %p849_p4 }
 0x155   :  { %v252_v17 = vadd.f32 1.0, %v751_v11  ;;  %v399_v18 = vmul.f32 %v378_v5, %v258_v9 }
 0x156   :  { %v259_v20 = vmul.f32 %v251_v13, %v227_v12 }
 0x157   :  { %v753_v21 = vpop.eup %752  ;;  %v260_v22 = vmul.f32 %v252_v17, %v228_v16  ;;  %506 = vmatprep.mubr.f32.mxu0 %v399_v18 }
 0x158   :  { %v755_v23 = vpop.eup %754  ;;  %v253_v25 = vadd.f32 1.0, %v753_v21  ;;  %v400_v26 = vmul.f32 %v382_v15, %v259_v20  ;;  %507 = vmatmul.mubr.f32.vlgmr.msra.gmra.mrb[8].mxu0 %v398_v14 }
 0x159   :  { %v254_v29 = vadd.f32 1.0, %v755_v23  ;;  %v401_v30 = vmul.f32 %v384_v19, %v260_v22 }
 0x15a   :  { %v261_v32 = vmul.f32 %v253_v25, %v229_v24 }
 0x15b   :  { %v757_v33 = vpop.eup %756  ;;  %v262_v34 = vmul.f32 %v254_v29, %v230_v28  ;;  %511 = vmatprep.mubr.f32.mxu0 %v401_v30 }
 0x15c   :  { %v759_v35 = vpop.eup %758  ;;  %v255_v37 = vadd.f32 1.0, %v757_v33  ;;  %v402_v38 = vmul.f32 %v388_v27, %v261_v32  ;;  %512 = vmatmul.mubr.f32.gmra.mrb[10].mxu0 %v400_v26 }
 0x15d   :  { %v256_v41 = vadd.f32 1.0, %v759_v35  ;;  %v403_v42 = vmul.f32 %v390_v31, %v262_v34 }
 0x15e   :  { %v263_v44 = vmul.f32 %v255_v37, %v231_v36 }
 0x15f   :  { %v264_v45 = vmul.f32 %v256_v41, %v232_v40  ;;  %516 = vmatprep.mubr.f32.mxu1 %v403_v42 }
 0x160   :  { %v404_v46 = vmul.f32 %v394_v39, %v263_v44  ;;  %517 = vmatmul.mubr.f32.vlgmr.msra.gmra.mrb[8].mxu1 %v402_v38 }
 0x161   :  { %v405_v47 = vmul.f32 %v396_v43, %v264_v45 }
 0x163   :  { %521 = vmatprep.mubr.f32.mxu1 %v405_v47 }
 0x164   :  { %522 = vmatmul.mubr.f32.gmra.mrb[10].mxu1 %v404_v46 }
 0x22b   :  { %v610_v48 = vpop.f32.mrb[8].mxu0 }
 0x22c   :  { %v611_v49 = vpop.f32.mrb[9].mxu0 }
 0x22d   :  { %v612_v50 = vadd.f32 %v611_v49, %v610_v48 }
 0x22f   :  { %v613_v52 = vpop.f32.mrb[10].mxu0  ;;  %v549_v55 = vadd.f32 %v612_v50, %v577_v51 }
 0x230   :  { %v614_v53 = vpop.f32.mrb[11].mxu0 }
 0x231   :  { %v615_v54 = vadd.f32 %v614_v53, %v613_v52  ;;  %553 = vst [vmem:[#allocation11] sm:$0xff] %v549_v55 }
 0x233   :  { %v616_v56 = vpop.f32.mrb[8].mxu1  ;;  %v550_v59 = vadd.f32 %v615_v54, %v577_v51 }
 0x234   :  { %v617_v57 = vpop.f32.mrb[9].mxu1 }
 0x235   :  { %v618_v58 = vadd.f32 %v617_v57, %v616_v56  ;;  %554 = vst [vmem:[#allocation11 + $0x8] sm:$0xff] %v550_v59 }
 0x237   :  { %v619_v60 = vpop.f32.mrb[10].mxu1  ;;  %v551_v63 = vadd.f32 %v618_v58, %v577_v51 }
 0x238   :  { %v620_v0 = vpop.f32.mrb[11].mxu1 }
 0x239   :  { %v621_v62 = vadd.f32 %v620_v0, %v619_v60  ;;  %555 = vst [vmem:[#allocation11 + $0x10] sm:$0xff] %v551_v63 }
 0x23b   :  { %v530_v1 = vadd.f32 %v621_v62, %v409_v61 }
 0x23d   :  { %534 = vst [vmem:[#allocation2 + $0x18] sm:$0x3] %v530_v1 }
 0x244   :  { %v541_v2 = vld [vmem:[#allocation2 + $0x18] sm:$0x3] }
 0x245   :  { %v552_v3 = vadd.f32 %v577_v51, %v541_v2 }
 0x247   :  { %556 = vst [vmem:[#allocation11 + $0x18] sm:$0x3] %v552_v3 }
 0x248   :  { %859 = shalt.err (!%p856_p8)
}
 0x249   :  { %s860_s9 = scalar_lea.hbm %s1029_s6, 512 }
 0x24a   :  { %p861_p9 = scmp.ne.s32.totalorder %s1029_s6, %s860_s9  ;;  %p864_p10 = scmp.lt.u32.totalorder %s860_s9, %s1029_s6 }
 0x24c   :  { %p866_p11 = pnand %p864_p10, %p861_p9 }
 0x24e   :  { %869 = shalt.err (!%p866_p11)
}
 0x24f   :  { %568 = dma.vmem_to_hbm [thread:$0]  %s563_s5, 512, %s1029_s6, [#allocation5], %s882_s1, %s882_s1, %s883_s21  }
 0x250   :  { %876 = dma.done.wait [#allocation5], 512  }
 0x251   :  { %877 = vsyncadd [#allocation5], 4294966784 }
 0x252   :  { %572 = vsyncpa [#allocation4], 1 }
 0x253   :  { %573 = vsyncpa [#allocation7], 1 }
 0x254   :  { %574 = vsyncpa [#allocation10], 1 }
 0x255   :  { %575 = vsyncpa [#allocation5], 1 }

</bundles_post_ra>
